<compile_context>
chip_gen: v5e
topology: v5e:2x2
jax: 0.10.0
libtpu: 0.0.40
codegen_flags: <defaults>
</compile_context>

<pallas_src>
import math

import jax
import jax.numpy as jnp
from jax.experimental import pallas as pl
from jax.experimental.pallas import tpu as pltpu

# The kernel consumes the quaternions in their *natural* HBM layout: the flat
# (w,x,y,z,w,x,y,z,...) stream viewed as (rows, 128) -- 32 interleaved
# quaternions per 128-lane row.  All per-quaternion reductions (x^2+y^2+z^2 and
# the w broadcast) are done in-register with lane rolls + selects (XLU work
# that hides under the memory bound), so there is no host-side (N,4)->(4,N)
# transpose, no transpose back, and no pad-to-block copy (Pallas masks the
# ragged edge block).  Every vreg is lane-dense.
#
# Per grid step: 4096 rows = 128K quaternions = 2 MiB in + 2 MiB out
# (double-buffered ~8 MiB) plus a few MiB of block-sized temporaries; this sits
# comfortably under the 48 MiB scoped-VMEM limit requested below (safe w.r.t.
# v7x's 64 MiB physical VMEM) while making the ~0.35 us per-grid-step overhead
# negligible on all of v5e / v6e / v7x.
_ROW_BLOCK = 4096
_LANE = 128


def _group4_sum(x, sel1, sel2):
    """Sum over each aligned group of 4 lanes, broadcast back to all 4 lanes.

    Butterfly over lanes: pair sums at distance 1, then cross-pair sums at
    distance 2.  `sel1` / `sel2` pick, per lane, which roll direction delivers
    the in-group partner; the selected source lane always stays inside the
    4-lane group, so roll wrap-around values are never used.
    """
    n = x.shape[-1]
    p1 = jnp.where(sel1, pltpu.roll(x, 1, axis=1), pltpu.roll(x, n - 1, axis=1))
    pair = x + p1
    p2 = jnp.where(sel2, pltpu.roll(pair, 2, axis=1), pltpu.roll(pair, n - 2, axis=1))
    return pair + p2


def _angle_axis_kernel(q_ref, o_ref):
    """Block (R, 128): lane l holds component (l % 4) of quaternion (32*row + l//4)."""
    q = q_ref[...].astype(jnp.float32)   # compute in f32 (input may be bf16; v5e has no bf16 VPU)

    # Per-lane component masks, built at (1, 128) and broadcast along sublanes.
    lane = jax.lax.broadcasted_iota(jnp.int32, (1, _LANE), 1)
    comp = lane % 4
    is_w = comp == 0
    is_odd = (comp % 2) == 1             # components x, z
    is_hi = comp >= 2                    # components y, z

    # pltpu.roll direction probe: `flipped` is all-True iff roll(x, 1) delivers
    # lane l+1 instead of lane l-1.  XOR-ing it into the partner selects makes
    # the butterfly correct under either rotation convention (few ops, (1,128)).
    probe = pltpu.roll(lane, 1, axis=1)
    flipped = probe == (lane + 1) % _LANE
    sel1 = jnp.logical_xor(is_odd, flipped)
    sel2 = jnp.logical_xor(is_hi, flipped)

    sq = q * q
    # x^2 + y^2 + z^2 of each quaternion, broadcast to all 4 of its lanes.
    sin_sq = _group4_sum(jnp.where(is_w, 0.0, sq), sel1, sel2)
    # w of each quaternion, broadcast to all 4 of its lanes (single nonzero per group).
    w = _group4_sum(jnp.where(is_w, q, 0.0), sel1, sel2)

    sin_th = jnp.sqrt(sin_sq)
    # Shortest-path angle with a single arctan2 (sin_th >= 0):
    #   where(w<0, atan2(-s,-w), atan2(s,w)) == sign(w) * atan2(s, |w|)
    sign_w = jnp.where(w < 0.0, -1.0, 1.0)
    two_theta = 2.0 * sign_w * jnp.arctan2(sin_th, jnp.abs(w))

    safe_sin = jnp.where(sin_th > 0.0, sin_th, 1.0)
    inv_sin = pl.reciprocal(safe_sin, approx=True)      # EUP slot
    inv_sin = inv_sin * (2.0 - safe_sin * inv_sin)      # one Newton step (~1e-5 rel.)
    # Small-angle limit: angle_axis -> 2 * v  (k -> 2).  Garbage lanes of a
    # ragged edge block may produce NaN here; those writes are dropped by the
    # masked output copy, so this is harmless.
    k = jnp.where(sin_sq > 0.0, two_theta * inv_sin, 2.0)

    # Emit in the same interleaved layout; the w slot is a dummy -> zero it.
    o_ref[...] = jnp.where(is_w, 0.0, q * k).astype(o_ref.dtype)


def angle_axis_map(q):
    """AngelAxisMap.forward: quaternion (..., 4) -> angle-axis (..., 3)."""
    orig_shape = q.shape
    assert orig_shape[-1] == 4, "expected quaternions on the last axis"
    n = math.prod(orig_shape[:-1])

    flat = q.reshape(-1)                        # free reshape, natural layout
    flat_len = 4 * n
    rows = pl.cdiv(flat_len, _LANE)
    padded_len = rows * _LANE
    if padded_len != flat_len:
        # Only for ragged n (n % 32 != 0); pads <= 124 trailing elements.
        # Zero padding is safe: sin_sq == 0 -> k == 2 -> padded outputs are 0.
        flat = jnp.pad(flat, (0, padded_len - flat_len))
    q2d = flat.reshape(rows, _LANE)

    row_block = min(_ROW_BLOCK, rows)           # full-dim block for tiny inputs
    grid = (pl.cdiv(rows, row_block),)          # ragged edge block is masked

    itemsize = jnp.dtype(q.dtype).itemsize
    cost = pl.CostEstimate(
        flops=45 * padded_len,
        transcendentals=3 * padded_len,
        bytes_accessed=2 * padded_len * itemsize,
    )

    out2d = pl.pallas_call(
        _angle_axis_kernel,
        out_shape=jax.ShapeDtypeStruct((rows, _LANE), q.dtype),
        grid=grid,
        in_specs=[pl.BlockSpec((row_block, _LANE), lambda i: (i, 0))],
        out_specs=pl.BlockSpec((row_block, _LANE), lambda i: (i, 0)),
        compiler_params=pltpu.CompilerParams(
            dimension_semantics=("parallel",),   # shards across v7x's 2 TCs
            vmem_limit_bytes=48 * 1024 * 1024,
        ),
        cost_estimate=cost,
    )(q2d)

    # Kernel output is (dummy, ax, ay, az) per quaternion in the input's own
    # interleaved layout; the final component slice is a cheap, fusible XLA op.
    # TODO(synk): emitting a (n, 3)-packed layout directly from the kernel
    # would need an in-kernel period-4 -> period-3 lane gather; left to XLA.
    out4 = out2d.reshape(-1)[:flat_len].reshape(n, 4)
    return out4[:, 1:].reshape(*orig_shape[:-1], 3)


if __name__ == "__main__":
    key = jax.random.PRNGKey(0)
    q = jax.random.normal(key, (2, 8, 4), dtype=jnp.float32)
    q = q / jnp.linalg.norm(q, axis=-1, keepdims=True)               # unit quaternions
    q = q.at[0, 0].set(jnp.array([1.0, 0.0, 0.0, 0.0], jnp.float32))  # identity (k=2 branch)
    q = q.at[0, 1].set(jnp.array([-0.5, 0.5, 0.5, 0.5], jnp.float32))  # negative-w path

    out = jax.block_until_ready(angle_axis_map(q))

    # plain-JAX reference for a sanity check
    w, v = q[..., :1], q[..., 1:]
    ss = jnp.sum(v * v, axis=-1, keepdims=True)
    st = jnp.sqrt(ss)
    tt = 2.0 * jnp.where(w < 0.0, jnp.arctan2(-st, -w), jnp.arctan2(st, w))
    kk = jnp.where(ss > 0.0, tt / jnp.where(st > 0.0, st, 1.0), 2.0)
    ref = v * kk

    assert out.shape == (2, 8, 3), out.shape
    # 1e-4 tolerance: kernel uses the EUP approximate reciprocal + one Newton
    # step vs. an exact divide in the reference.
    assert jnp.allclose(out, ref, atol=1e-4, rtol=1e-4), (out, ref)
    print("KERNEL_OK")
</pallas_src>

<mosaic_0001>
module attributes {stable_mosaic.version = 11 : i64} {
  func.func @_angle_axis_kernel(%arg0: i32, %arg1: memref<1x128xf32, #tpu.memory_space<vmem>>, %arg2: memref<1x128xf32, #tpu.memory_space<vmem>>) attributes {dimension_semantics = [#tpu.dimension_semantics<parallel>], iteration_bounds = array<i64: 1>, scalar_prefetch = 0 : i64, scratch_operands = 0 : i64, tpu.core_type = #tpu.core_type<tc>, window_params = [{transform_indices = @transform_0, window_bounds = array<i64: 1, 128>}, {transform_indices = @transform_1, window_bounds = array<i64: 1, 128>}]} {
    %c0 = arith.constant 0 : index
    %c0_0 = arith.constant 0 : index
    %0 = vector.load %arg1[%c0, %c0_0] : memref<1x128xf32, #tpu.memory_space<vmem>>, vector<1x128xf32>
    %1 = tpu.iota {dimensions = array<i32: 1>} : vector<1x128xi32>
    %c4_i32 = arith.constant 4 : i32
    %c0_i32 = arith.constant 0 : i32
    %2 = arith.cmpi eq, %c4_i32, %c0_i32 : i32
    %c1_i32 = arith.constant 1 : i32
    %3 = arith.select %2, %c1_i32, %c4_i32 : i32
    %4 = vector.broadcast %3 : i32 to vector<1x128xi32>
    %5 = arith.remsi %1, %4 : vector<1x128xi32>
    %c0_i32_1 = arith.constant 0 : i32
    %6 = vector.broadcast %c0_i32_1 : i32 to vector<1x128xi32>
    %7 = arith.cmpi ne, %5, %6 : vector<1x128xi32>
    %c0_i32_2 = arith.constant 0 : i32
    %8 = vector.broadcast %c0_i32_2 : i32 to vector<1x128xi32>
    %9 = arith.cmpi slt, %5, %8 : vector<1x128xi32>
    %c0_i32_3 = arith.constant 0 : i32
    %10 = arith.cmpi slt, %3, %c0_i32_3 : i32
    %11 = vector.broadcast %10 : i1 to vector<1x128xi1>
    %12 = vector.broadcast %11 : vector<1x128xi1> to vector<1x128xi1>
    %13 = arith.xori %9, %12 : vector<1x128xi1>
    %14 = arith.andi %13, %7 : vector<1x128xi1>
    %15 = vector.broadcast %3 : i32 to vector<1x128xi32>
    %16 = arith.addi %5, %15 : vector<1x128xi32>
    %17 = arith.select %14, %16, %5 : vector<1x128xi1>, vector<1x128xi32>
    %c0_i32_4 = arith.constant 0 : i32
    %18 = vector.broadcast %c0_i32_4 : i32 to vector<1x128xi32>
    %19 = arith.cmpi eq, %17, %18 : vector<1x128xi32>
    %c2_i32 = arith.constant 2 : i32
    %c0_i32_5 = arith.constant 0 : i32
    %20 = arith.cmpi eq, %c2_i32, %c0_i32_5 : i32
    %c1_i32_6 = arith.constant 1 : i32
    %21 = arith.select %20, %c1_i32_6, %c2_i32 : i32
    %22 = vector.broadcast %21 : i32 to vector<1x128xi32>
    %23 = arith.remsi %17, %22 : vector<1x128xi32>
    %c0_i32_7 = arith.constant 0 : i32
    %24 = vector.broadcast %c0_i32_7 : i32 to vector<1x128xi32>
    %25 = arith.cmpi ne, %23, %24 : vector<1x128xi32>
    %c0_i32_8 = arith.constant 0 : i32
    %26 = vector.broadcast %c0_i32_8 : i32 to vector<1x128xi32>
    %27 = arith.cmpi slt, %23, %26 : vector<1x128xi32>
    %c0_i32_9 = arith.constant 0 : i32
    %28 = arith.cmpi slt, %21, %c0_i32_9 : i32
    %29 = vector.broadcast %28 : i1 to vector<1x128xi1>
    %30 = vector.broadcast %29 : vector<1x128xi1> to vector<1x128xi1>
    %31 = arith.xori %27, %30 : vector<1x128xi1>
    %32 = arith.andi %31, %25 : vector<1x128xi1>
    %33 = vector.broadcast %21 : i32 to vector<1x128xi32>
    %34 = arith.addi %23, %33 : vector<1x128xi32>
    %35 = arith.select %32, %34, %23 : vector<1x128xi1>, vector<1x128xi32>
    %c1_i32_10 = arith.constant 1 : i32
    %36 = vector.broadcast %c1_i32_10 : i32 to vector<1x128xi32>
    %37 = arith.cmpi eq, %35, %36 : vector<1x128xi32>
    %c2_i32_11 = arith.constant 2 : i32
    %38 = vector.broadcast %c2_i32_11 : i32 to vector<1x128xi32>
    %39 = arith.cmpi sge, %17, %38 : vector<1x128xi32>
    %c1_i32_12 = arith.constant 1 : i32
    %40 = tpu.dynamic_rotate %1 by %c1_i32_12 dim 1 : vector<1x128xi32>, i32 -> vector<1x128xi32>
    %c1_i32_13 = arith.constant 1 : i32
    %41 = vector.broadcast %c1_i32_13 : i32 to vector<1x128xi32>
    %42 = arith.addi %1, %41 : vector<1x128xi32>
    %c128_i32 = arith.constant 128 : i32
    %c0_i32_14 = arith.constant 0 : i32
    %43 = arith.cmpi eq, %c128_i32, %c0_i32_14 : i32
    %c1_i32_15 = arith.constant 1 : i32
    %44 = arith.select %43, %c1_i32_15, %c128_i32 : i32
    %45 = vector.broadcast %44 : i32 to vector<1x128xi32>
    %46 = arith.remsi %42, %45 : vector<1x128xi32>
    %c0_i32_16 = arith.constant 0 : i32
    %47 = vector.broadcast %c0_i32_16 : i32 to vector<1x128xi32>
    %48 = arith.cmpi ne, %46, %47 : vector<1x128xi32>
    %c0_i32_17 = arith.constant 0 : i32
    %49 = vector.broadcast %c0_i32_17 : i32 to vector<1x128xi32>
    %50 = arith.cmpi slt, %46, %49 : vector<1x128xi32>
    %c0_i32_18 = arith.constant 0 : i32
    %51 = arith.cmpi slt, %44, %c0_i32_18 : i32
    %52 = vector.broadcast %51 : i1 to vector<1x128xi1>
    %53 = vector.broadcast %52 : vector<1x128xi1> to vector<1x128xi1>
    %54 = arith.xori %50, %53 : vector<1x128xi1>
    %55 = arith.andi %54, %48 : vector<1x128xi1>
    %56 = vector.broadcast %44 : i32 to vector<1x128xi32>
    %57 = arith.addi %46, %56 : vector<1x128xi32>
    %58 = arith.select %55, %57, %46 : vector<1x128xi1>, vector<1x128xi32>
    %59 = arith.cmpi eq, %40, %58 : vector<1x128xi32>
    %60 = arith.xori %37, %59 : vector<1x128xi1>
    %61 = arith.xori %39, %59 : vector<1x128xi1>
    %62 = arith.mulf %0, %0 : vector<1x128xf32>
    %cst = arith.constant 0.000000e+00 : f32
    %63 = vector.broadcast %cst : f32 to vector<1x128xf32>
    %64 = arith.select %19, %63, %62 : vector<1x128xi1>, vector<1x128xf32>
    %c1_i32_19 = arith.constant 1 : i32
    %65 = tpu.dynamic_rotate %64 by %c1_i32_19 dim 1 : vector<1x128xf32>, i32 -> vector<1x128xf32>
    %c127_i32 = arith.constant 127 : i32
    %66 = tpu.dynamic_rotate %64 by %c127_i32 dim 1 : vector<1x128xf32>, i32 -> vector<1x128xf32>
    %67 = arith.select %60, %65, %66 : vector<1x128xi1>, vector<1x128xf32>
    %68 = arith.addf %64, %67 : vector<1x128xf32>
    %c2_i32_20 = arith.constant 2 : i32
    %69 = tpu.dynamic_rotate %68 by %c2_i32_20 dim 1 : vector<1x128xf32>, i32 -> vector<1x128xf32>
    %c126_i32 = arith.constant 126 : i32
    %70 = tpu.dynamic_rotate %68 by %c126_i32 dim 1 : vector<1x128xf32>, i32 -> vector<1x128xf32>
    %71 = arith.select %61, %69, %70 : vector<1x128xi1>, vector<1x128xf32>
    %72 = arith.addf %68, %71 : vector<1x128xf32>
    %cst_21 = arith.constant 0.000000e+00 : f32
    %73 = vector.broadcast %cst_21 : f32 to vector<1x128xf32>
    %74 = arith.select %19, %0, %73 : vector<1x128xi1>, vector<1x128xf32>
    %c1_i32_22 = arith.constant 1 : i32
    %75 = tpu.dynamic_rotate %74 by %c1_i32_22 dim 1 : vector<1x128xf32>, i32 -> vector<1x128xf32>
    %c127_i32_23 = arith.constant 127 : i32
    %76 = tpu.dynamic_rotate %74 by %c127_i32_23 dim 1 : vector<1x128xf32>, i32 -> vector<1x128xf32>
    %77 = arith.select %60, %75, %76 : vector<1x128xi1>, vector<1x128xf32>
    %78 = arith.addf %74, %77 : vector<1x128xf32>
    %c2_i32_24 = arith.constant 2 : i32
    %79 = tpu.dynamic_rotate %78 by %c2_i32_24 dim 1 : vector<1x128xf32>, i32 -> vector<1x128xf32>
    %c126_i32_25 = arith.constant 126 : i32
    %80 = tpu.dynamic_rotate %78 by %c126_i32_25 dim 1 : vector<1x128xf32>, i32 -> vector<1x128xf32>
    %81 = arith.select %61, %79, %80 : vector<1x128xi1>, vector<1x128xf32>
    %82 = arith.addf %78, %81 : vector<1x128xf32>
    %83 = math.sqrt %72 : vector<1x128xf32>
    %cst_26 = arith.constant 0.000000e+00 : f32
    %84 = vector.broadcast %cst_26 : f32 to vector<1x128xf32>
    %85 = arith.cmpf olt, %82, %84 : vector<1x128xf32>
    %cst_27 = arith.constant -1.000000e+00 : f32
    %cst_28 = arith.constant 1.000000e+00 : f32
    %86 = vector.broadcast %cst_27 : f32 to vector<1x128xf32>
    %87 = vector.broadcast %cst_28 : f32 to vector<1x128xf32>
    %88 = arith.select %85, %86, %87 : vector<1x128xi1>, vector<1x128xf32>
    %cst_29 = arith.constant 2.000000e+00 : f32
    %89 = vector.broadcast %cst_29 : f32 to vector<1x128xf32>
    %90 = arith.mulf %89, %88 : vector<1x128xf32>
    %91 = math.absf %82 : vector<1x128xf32>
    %92 = math.atan2 %83, %91 : vector<1x128xf32>
    %93 = arith.mulf %90, %92 : vector<1x128xf32>
    %cst_30 = arith.constant 0.000000e+00 : f32
    %94 = vector.broadcast %cst_30 : f32 to vector<1x128xf32>
    %95 = arith.cmpf ogt, %83, %94 : vector<1x128xf32>
    %cst_31 = arith.constant 1.000000e+00 : f32
    %96 = vector.broadcast %cst_31 : f32 to vector<1x128xf32>
    %97 = arith.select %95, %83, %96 : vector<1x128xi1>, vector<1x128xf32>
    %98 = tpu.reciprocal %97 {approx = true} : vector<1x128xf32> -> vector<1x128xf32>
    %99 = arith.mulf %97, %98 : vector<1x128xf32>
    %cst_32 = arith.constant 2.000000e+00 : f32
    %100 = vector.broadcast %cst_32 : f32 to vector<1x128xf32>
    %101 = arith.subf %100, %99 : vector<1x128xf32>
    %102 = arith.mulf %98, %101 : vector<1x128xf32>
    %cst_33 = arith.constant 0.000000e+00 : f32
    %103 = vector.broadcast %cst_33 : f32 to vector<1x128xf32>
    %104 = arith.cmpf ogt, %72, %103 : vector<1x128xf32>
    %105 = arith.mulf %93, %102 : vector<1x128xf32>
    %cst_34 = arith.constant 2.000000e+00 : f32
    %106 = vector.broadcast %cst_34 : f32 to vector<1x128xf32>
    %107 = arith.select %104, %105, %106 : vector<1x128xi1>, vector<1x128xf32>
    %108 = arith.mulf %0, %107 : vector<1x128xf32>
    %cst_35 = arith.constant 0.000000e+00 : f32
    %109 = vector.broadcast %cst_35 : f32 to vector<1x128xf32>
    %110 = arith.select %19, %109, %108 : vector<1x128xi1>, vector<1x128xf32>
    %c0_36 = arith.constant 0 : index
    %c0_37 = arith.constant 0 : index
    %111 = vector.load %arg2[%c0_36, %c0_37] : memref<1x128xf32, #tpu.memory_space<vmem>>, vector<1x128xf32>
    tpu.vector_store %arg2[%c0_36, %c0_37], %110 {strides = array<i32>} : memref<1x128xf32, #tpu.memory_space<vmem>>, vector<1x128xf32>,
    return
  }
  func.func @transform_0(%arg0: i32) -> (i32, i32) {
    %c0_i32 = arith.constant 0 : i32
    %c0_i32_0 = arith.constant 0 : i32
    return %arg0, %c0_i32 : i32, i32
  }
  func.func @transform_1(%arg0: i32) -> (i32, i32) {
    %c0_i32 = arith.constant 0 : i32
    %c0_i32_0 = arith.constant 0 : i32
    return %arg0, %c0_i32 : i32, i32
  }
}

</mosaic_0001>

<bundles_post_ra>
// kernel: tpu_custom_call.1
= control target key start
LH: loop header
LB: loop body
LE: loop exit
PB: predicated region body
PF: predicated region fallthrough
CT: control target
= control target key end

     0   :  { %6 = vsyncpa [#allocation3], 0  ;;  %s361_s0 = inlined_call_operand.hbm [shape: f32[1,128], index: 0, kind: input, shape index: {}]   ;;  %s362_s1 = inlined_call_operand.hbm [shape: f32[1,128], index: 1, kind: output, shape index: {}]  }
   0x1   :  { %7 = vsyncpa [#allocation4], 0  ;;  %s13_s8 = sshll.u32 %s361_s0, 4  ;;  %s268_s9 = smov [#allocation2]   ;;  %s14_s8 = int_to_ptr.hbm [resolvable:$true] %s13_s8 }
   0x2   :  { %s15_s10 = sshll.u32 %s268_s9, 4  ;;  %s16_s10 = int_to_ptr.vmem [resolvable:$true] %s15_s10 }
   0x3   :  { %18 = dma.hbm_to_vmem [thread:$0]  %s14_s8, 16, %s16_s10, [#allocation3]  }
   0x4   :  { %264 = dma.done.wait [#allocation3], 16  }
   0x5   :  { %265 = vsyncadd [#allocation3], 4294967280  ;;  %v24_v0 = vlaneseq  ;;  %s269_s11 = smov 1   ;;  %v291_v3 = vld [vmem:[#allocation2] sm:$0x1]  ;;  %s270_s0 = smov 127  }
   0x6   :  { %v71_v4 = vmul.f32 %v291_v3, %v291_v3  ;;  %s271_s12 = smov 126   ;;  %s272_s13 = smov 2  }
   0x7   :  { %v25_v1 = vand.u32 127, %v24_v0  ;;  %s275_s14 = smov [#allocation5]   ;;  %s192_s18 = sshll.u32 %s362_s1, 4  ;;  %s193_s18 = int_to_ptr.hbm [resolvable:$true] %s192_s18 }
   0x8   :  { %s190_s15 = sshll.u32 %s275_s14, 4  ;;  %s191_s15 = int_to_ptr.vmem [resolvable:$true] %s190_s15 }
   0x9   :  { %53 = vrot.lane.b32.xlu0 %v25_v1, %s269_s11  ;;  %v289_v2 = vand.u32 3, %v25_v1  ;;  %v55_v7 = vadd.s32 1, %v25_v1 }
   0xb   :  { %vm38_vm0 = vcmp.eq.s32.totalorder %v289_v2, 0  ;;  %v43_v9 = vand.u32 1, %v289_v2  ;;  %v60_v10 = vand.u32 127, %v55_v7  ;;  %vm52_vm4 = vcmp.ge.s32.totalorder %v289_v2, 2 }
   0xc   :  { %v85_v5 = vsel %vm38_vm0, %v291_v3, 0.0  ;;  %v72_v6 = vsel %vm38_vm0, 0.0, %v71_v4 }
   0xd   :  { %88 = vrot.lane.b32.xlu2 %v85_v5, %s270_s0  ;;  %75 = vrot.lane.b32.xlu1 %v72_v6, %s270_s0  ;;  %vm51_vm1 = vcmp.eq.s32.totalorder %v43_v9, 1 }
  0x11   :  { %73 = vrot.lane.b32.xlu0 %v72_v6, %s269_s11 }
  0x15   :  { %86 = vrot.lane.b32.xlu1 %v85_v5, %s269_s11 }
  0x67   :  { %v89_v16 = vpop.permute.xlu2 %88 }
  0x7b   :  { %v54_v8 = vpop.permute.xlu0 %53 }
  0x7c   :  { %vm302_vm2 = vcmp.eq.s32.totalorder %v54_v8, %v60_v10 }
  0x7d   :  { %vm69_vm3 = vmxor %vm51_vm1, %vm302_vm2 }
  0x7e   :  { %vm70_vm5 = vmxor %vm52_vm4, %vm302_vm2 }
  0x7f   :  { %v76_v12 = vpop.permute.xlu1 %75 }
  0x83   :  { %v74_v13 = vpop.permute.xlu0 %73 }
  0x84   :  { %v77_v14 = vsel %vm69_vm3, %v74_v13, %v76_v12 }
  0x85   :  { %v78_v15 = vadd.f32 %v77_v14, %v72_v6 }
  0x87   :  { %81 = vrot.lane.b32.xlu0 %v78_v15, %s271_s12  ;;  %79 = vrot.lane.b32.xlu2 %v78_v15, %s272_s13  ;;  %v87_v17 = vpop.permute.xlu1 %86 }
  0x88   :  { %v90_v18 = vsel %vm69_vm3, %v87_v17, %v89_v16 }
  0x89   :  { %v91_v19 = vadd.f32 %v90_v18, %v85_v5 }
  0x8b   :  { %92 = vrot.lane.b32.xlu1 %v91_v19, %s272_s13 }
  0x8f   :  { %94 = vrot.lane.b32.xlu2 %v91_v19, %s271_s12 }
  0xe1   :  { %v80_v20 = vpop.permute.xlu2 %79 }
  0xe9   :  { %v95_v27 = vpop.permute.xlu2 %94 }
  0xf9   :  { %v82_v21 = vpop.permute.xlu0 %81 }
  0xfa   :  { %v83_v22 = vsel %vm70_vm5, %v80_v20, %v82_v21  ;;  %v273_v20 = vmov 0.7853982  }
  0xfb   :  { %v311_v23 = vadd.f32 %v83_v22, %v78_v15  ;;  %v274_v22 = vmov 1.0  }
  0xfd   :  { %210 = vrsqrt.f32 %v311_v23  ;;  %v93_v25 = vpop.permute.xlu1 %92  ;;  %vm105_vm6 = vcmp.eq.f32.partialorder %v311_v23, inf  ;;  %v108_v36 = vand.u32 2147483648, %v311_v23  ;;  %vm107_vm7 = vcmp.eq.f32.partialorder %v311_v23, 0.0 }
  0xfe   :  { %v96_v29 = vsel %vm70_vm5, %v93_v25, %v95_v27 }
  0xff   :  { %v315_v31 = vadd.f32 %v96_v29, %v91_v19 }
 0x101   :  { %v319_v35 = vand.u32 2147483647, %v315_v31 }
 0x103   :  { %v211_v24 = vpop.eup %210  ;;  %vm159_vm8 = vcmp.ne.f32.partialorder %v319_v35, %v319_v35  ;;  %vm165_vm11 = vcmp.eq.s32.totalorder %v319_v35, inf  ;;  %vm154_vm5 = vcmp.lt.f32.partialorder %v319_v35, 0.0 }
 0x104   :  { %v99_v26 = vmul.f32 %v211_v24, %v311_v23  ;;  %v164_v21 = vsel %vm154_vm5, 2.3561945, %v273_v20 }
 0x106   :  { %v100_v28 = vmul.f32 %v211_v24, %v99_v26 }
 0x108   :  { %v101_v30 = vmul.f32 0.5, %v100_v28 }
 0x10a   :  { %v102_v32 = vsub.f32 1.5, %v101_v30 }
 0x10c   :  { %v103_v33 = vmul.f32 %v211_v24, %v102_v32 }
 0x10e   :  { %v104_v34 = vmul.f32 %v103_v33, %v311_v23 }
 0x110   :  { %v106_v37 = vsel %vm105_vm6, %v311_v23, %v104_v34  ;;  %vm110_vm6 = vcmp.lt.f32.partialorder %v315_v31, 0.0 }
 0x111   :  { %v325_v38 = vsel %vm107_vm7, %v108_v36, %v106_v37  ;;  %v111_v24 = vsel %vm110_vm6, -1.0, %v274_v22 }
 0x112   :  { %v115_v39 = vand.u32 2147483647, %v325_v38  ;;  %vm160_vm9 = vcmp.ne.f32.partialorder %v325_v38, %v325_v38  ;;  %vm173_vm3 = vcmp.gt.f32.partialorder %v325_v38, 0.0  ;;  %vm157_vm7 = vcmp.eq.f32.partialorder %v325_v38, 0.0 }
 0x113   :  { %vm332_vm10 = vmor %vm159_vm8, %vm160_vm9  ;;  %v174_v8 = vsel %vm173_vm3, %v325_v38, 1.0  ;;  %v170_v27 = vand.u32 2147483648, %v325_v38  ;;  %v112_v29 = vmul.f32 2.0, %v111_v24  ;;  %vm179_vm8 = vcmp.gt.f32.partialorder %v311_v23, 0.0 }
 0x114   :  { %v117_v41 = vmax.f32 %v319_v35, %v115_v39  ;;  %vm166_vm12 = vcmp.eq.s32.totalorder %v115_v39, inf  ;;  %v116_v51 = vmin.f32 %v319_v35, %v115_v39  ;;  %vm151_vm4 = vcmp.gt.f32.partialorder %v115_v39, %v319_v35 }
 0x115   :  { %vm338_vm13 = vmand %vm165_vm11, %vm166_vm12 }
 0x116   :  { %212 = vrcp.f32 %v117_v41  ;;  %v129_v46 = vand.u32 2147483648, %v117_v41  ;;  %v127_v48 = vand.u32 2147483647, %v117_v41  ;;  %vm123_vm15 = vweird.f32 %v117_v41 }
 0x117   :  { %214 = vrcp.f32 %v174_v8 }
 0x118   :  { %v130_v50 = vor.u32 1.1754944e-38, %v129_v46  ;;  %vm128_vm2 = vcmp.eq.f32.partialorder %v127_v48, 8.507059e+37 }
 0x11c   :  { %v213_v43 = vpop.eup %212 }
 0x11d   :  { %v119_v44 = vmul.f32 %v213_v43, %v117_v41  ;;  %vm124_vm14 = vweird.f32 %v213_v43  ;;  %v215_v13 = vpop.eup %214 }
 0x11e   :  { %vm125_vm1 = vmor %vm123_vm15, %vm124_vm14  ;;  %v176_v17 = vmul.f32 %v215_v13, %v174_v8 }
 0x11f   :  { %v120_v45 = vsub.f32 1.0, %v119_v44 }
 0x120   :  { %v177_v28 = vsub.f32 2.0, %v176_v17 }
 0x121   :  { %v121_v47 = vmul.f32 %v213_v43, %v120_v45 }
 0x122   :  { %v178_v32 = vmul.f32 %v215_v13, %v177_v28 }
 0x123   :  { %v122_v49 = vadd.f32 %v213_v43, %v121_v47 }
 0x125   :  { %v126_v52 = vsel %vm125_vm1, %v213_v43, %v122_v49 }
 0x126   :  { %v131_v53 = vsel %vm128_vm2, %v130_v50, %v126_v52 }
 0x127   :  { %v132_v54 = vmul.f32 %v131_v53, %v116_v51 }
 0x129   :  { %v133_v55 = vmul.f32 %v132_v54, %v132_v54 }
 0x12b   :  { %v134_v56 = vmul.f32 0.002785687, %v133_v55 }
 0x12d   :  { %v135_v57 = vadd.f32 -0.015866, %v134_v56 }
 0x12f   :  { %v136_v58 = vmul.f32 %v135_v57, %v133_v55 }
 0x131   :  { %v137_v59 = vadd.f32 0.04247222, %v136_v58 }
 0x133   :  { %v138_v60 = vmul.f32 %v137_v59, %v133_v55 }
 0x135   :  { %v139_v61 = vadd.f32 -0.074975304, %v138_v60 }
 0x137   :  { %v140_v62 = vmul.f32 %v139_v61, %v133_v55 }
 0x139   :  { %v141_v63 = vadd.f32 0.1064488, %v140_v62 }
 0x13b   :  { %v142_v0 = vmul.f32 %v141_v63, %v133_v55 }
 0x13d   :  { %v143_v1 = vadd.f32 -0.14207031, %v142_v0 }
 0x13f   :  { %v144_v4 = vmul.f32 %v143_v1, %v133_v55 }
 0x141   :  { %v145_v5 = vadd.f32 0.19993454, %v144_v4 }
 0x143   :  { %v146_v6 = vmul.f32 %v145_v5, %v133_v55 }
 0x145   :  { %v147_v7 = vadd.f32 -0.33333147, %v146_v6 }
 0x147   :  { %v148_v9 = vmul.f32 %v147_v7, %v133_v55 }
 0x149   :  { %v149_v10 = vmul.f32 %v148_v9, %v132_v54 }
 0x14b   :  { %v150_v11 = vadd.f32 %v149_v10, %v132_v54 }
 0x14d   :  { %v152_v12 = vsub.f32 1.5707964, %v150_v11 }
 0x14f   :  { %v153_v14 = vsel %vm151_vm4, %v152_v12, %v150_v11 }
 0x150   :  { %v155_v15 = vsub.f32 3.1415927, %v153_v14 }
 0x152   :  { %v156_v16 = vsel %vm154_vm5, %v155_v15, %v153_v14 }
 0x153   :  { %v158_v18 = vsel %vm157_vm7, 0.0, %v156_v16 }
 0x154   :  { %v162_v19 = vsel %vm332_vm10, nan, %v158_v18 }
 0x155   :  { %v168_v25 = vsel %vm338_vm13, %v164_v21, %v162_v19 }
 0x156   :  { %v169_v26 = vand.u32 2147483647, %v168_v25 }
 0x158   :  { %v171_v30 = vor.u32 %v170_v27, %v169_v26 }
 0x15a   :  { %v172_v31 = vmul.f32 %v171_v30, %v112_v29 }
 0x15c   :  { %v180_v33 = vmul.f32 %v178_v32, %v172_v31 }
 0x15e   :  { %v181_v34 = vsel %vm179_vm8, %v180_v33, 2.0 }
 0x15f   :  { %v182_v35 = vmul.f32 %v181_v34, %v291_v3 }
 0x161   :  { %v183_v36 = vsel %vm38_vm0, 0.0, %v182_v35 }
 0x162   :  { %184 = vst [vmem:[#allocation5] sm:$0x1] %v183_v36 }
 0x163   :  { %195 = dma.vmem_to_hbm [thread:$0]  %s191_s15, 16, %s193_s18, [#allocation4]  }
 0x164   :  { %266 = dma.done.wait [#allocation4], 16  }
 0x165   :  { %267 = vsyncadd [#allocation4], 4294967280 }
 0x166   :  { %200 = vsyncpa [#allocation3], 1 }
 0x167   :  { %201 = vsyncpa [#allocation4], 1 }

</bundles_post_ra>
